<compile_context>
chip_gen: v7x
topology: tpu7x:2x2x1
jax: 0.10.0
libtpu: 0.0.40
codegen_flags: <defaults>
</compile_context>

<pallas_src>
import functools

import jax
import jax.numpy as jnp
from jax import lax
from jax.experimental import pallas as pl
from jax.experimental.pallas import tpu as pltpu


def _planar_flow_kernel_folded(z_ref, w_ref, s_ref, m_ref, b_ref, o_ref):
    zf = z_ref[...].astype(jnp.float32)            # (TB, L), L = fold * dim
    w = w_ref[...]                                 # (1, L) f32, weight tiled
    s = s_ref[...]                                 # (1, L) f32, scale tiled
    b = b_ref[0]                                   # f32 scalar (SMEM)

    zw = zf * w                                    # VPU, exact f32
    # Segmented reduce + broadcast in one MXU op: M[i, j] = 1 iff lanes i and j
    # belong to the same folded logical row.  0/1 entries + HIGHEST precision
    # => exact f32 segment sums, broadcast across each row's lanes.
    act = jnp.dot(zw, m_ref[...],
                  preferred_element_type=jnp.float32,
                  precision=lax.Precision.HIGHEST) + b
    o_ref[...] = (zf + s * jnp.tanh(act)).astype(o_ref.dtype)   # EUP tanh, VPU


def _planar_flow_kernel_simple(z_ref, w_ref, s_ref, b_ref, o_ref):
    zf = z_ref[...].astype(jnp.float32)            # (TB, D)
    w = w_ref[...]                                 # (1, D) f32
    s = s_ref[...]                                 # (1, D) f32
    b = b_ref[0]                                   # f32 scalar (SMEM)
    act = jnp.sum(zf * w, axis=-1, keepdims=True) + b   # single XLU lane reduce
    o_ref[...] = (zf + s * jnp.tanh(act)).astype(o_ref.dtype)


def planar_flow(z, weight, scale, bias, *, block_rows=2048):
    B, D = z.shape
    orig_dtype = z.dtype

    # Fold factor: pack `fold` logical rows per physical row so the lane (last)
    # dimension is 128-wide whenever dim divides 128 and B permits it.
    fold = 1
    if D < 128 and 128 % D == 0:
        fold = 128 // D
        while fold > 1 and B % fold != 0:
            fold //= 2
    L = fold * D
    Bf = B // fold

    z_f = z.reshape(Bf, L)                                        # free reshape
    w_t = jnp.tile(weight.reshape(1, D).astype(jnp.float32), (1, fold))
    s_t = jnp.tile(scale.reshape(1, D).astype(jnp.float32), (1, fold))
    b_s = bias.reshape(1).astype(jnp.float32)                     # SMEM scalar

    # Batch tile: full array when small, otherwise a multiple-of-8 row block
    # whose double-buffered in+out footprint stays ~4 MiB.
    if Bf <= block_rows:
        tb = Bf
    else:
        tb = max(8, (block_rows // 8) * 8)
    grid = (pl.cdiv(Bf, tb),)

    in_specs = [
        pl.BlockSpec((tb, L), lambda i: (i, 0)),              # z (streamed)
        pl.BlockSpec((1, L), lambda i: (0, 0)),               # weight (resident)
        pl.BlockSpec((1, L), lambda i: (0, 0)),               # scale (resident)
    ]
    inputs = [z_f, w_t, s_t]

    if fold > 1:
        lane = jnp.arange(L, dtype=jnp.int32)
        seg_mat = ((lane[:, None] // D) == (lane[None, :] // D)).astype(jnp.float32)
        in_specs.append(pl.BlockSpec((L, L), lambda i: (0, 0)))  # segment matrix (resident)
        inputs.append(seg_mat)
        kernel = _planar_flow_kernel_folded
        mxu_flops = 2 * Bf * L * L
        mat_bytes = 4 * L * L
    else:
        kernel = _planar_flow_kernel_simple
        mxu_flops = 0
        mat_bytes = 0

    in_specs.append(pl.BlockSpec(memory_space=pltpu.MemorySpace.SMEM))  # bias scalar
    inputs.append(b_s)

    itemsize = jnp.dtype(orig_dtype).itemsize
    cost = pl.CostEstimate(
        flops=4 * B * D + mxu_flops,
        transcendentals=B,
        bytes_accessed=2 * B * D * itemsize + 2 * L * 4 + mat_bytes + 4,
    )

    out_f = pl.pallas_call(
        kernel,
        out_shape=jax.ShapeDtypeStruct((Bf, L), orig_dtype),
        grid_spec=pltpu.PrefetchScalarGridSpec(
            num_scalar_prefetch=0,
            grid=grid,
            in_specs=in_specs,
            out_specs=pl.BlockSpec((tb, L), lambda i: (i, 0)),
        ),
        compiler_params=pltpu.CompilerParams(
            dimension_semantics=("parallel",),
        ),
        cost_estimate=cost,
    )(*inputs)

    return out_f.reshape(B, D)


def planar_flow_ref(z, weight, scale, bias):
    # Same math as F.linear(z, weight, bias) with a (1, dim) weight, done
    # elementwise so the reference is exact f32 (no matmul precision surprises).
    activation = jnp.sum(z * weight, axis=-1, keepdims=True) + bias
    return z + scale * jnp.tanh(activation)


if __name__ == "__main__":
    key = jax.random.PRNGKey(0)
    kz, kw, ks, kb = jax.random.split(key, 4)

    B, D = 8, 32  # small shapes consistent with the module (dim=32)

    # Deterministic parameter init matching reset_parameters(): uniform(-0.01, 0.01)
    weight = jax.random.uniform(kw, (1, D), jnp.float32, -0.01, 0.01)
    scale = jax.random.uniform(ks, (1, D), jnp.float32, -0.01, 0.01)
    bias = jax.random.uniform(kb, (1,), jnp.float32, -0.01, 0.01)

    z = jax.random.normal(kz, (B, D), jnp.float32)

    out = planar_flow(z, weight, scale, bias)
    out = jax.block_until_ready(out)

    ref = planar_flow_ref(z, weight, scale, bias)
    assert out.shape == (B, D)
    assert jnp.allclose(out, ref, atol=1e-6, rtol=1e-6), "mismatch vs reference"

    print("KERNEL_OK")
</pallas_src>

<mosaic_0001>
module attributes {stable_mosaic.version = 11 : i64} {
  func.func @_planar_flow_kernel_folded(%arg0: i32, %arg1: memref<2x128xf32, #tpu.memory_space<vmem>>, %arg2: memref<1x128xf32, #tpu.memory_space<vmem>>, %arg3: memref<1x128xf32, #tpu.memory_space<vmem>>, %arg4: memref<128x128xf32, #tpu.memory_space<vmem>>, %arg5: memref<1xf32, #tpu.memory_space<smem>>, %arg6: memref<2x128xf32, #tpu.memory_space<vmem>>) attributes {dimension_semantics = [#tpu.dimension_semantics<parallel>], iteration_bounds = array<i64: 1>, scalar_prefetch = 0 : i64, scratch_operands = 0 : i64, tpu.core_type = #tpu.core_type<tc>, window_params = [{transform_indices = @transform_0, window_bounds = array<i64: 2, 128>}, {pipeline_mode = #tpu.pipeline_mode<synchronous>, transform_indices = @transform_1, window_bounds = array<i64: 1, 128>}, {pipeline_mode = #tpu.pipeline_mode<synchronous>, transform_indices = @transform_2, window_bounds = array<i64: 1, 128>}, {pipeline_mode = #tpu.pipeline_mode<synchronous>, transform_indices = @transform_3, window_bounds = array<i64: 128, 128>}, {transform_indices = @transform_4, window_bounds = array<i64: 1>}, {transform_indices = @transform_5, window_bounds = array<i64: 2, 128>}]} {
    %c0 = arith.constant 0 : index
    %c0_0 = arith.constant 0 : index
    %0 = vector.load %arg1[%c0, %c0_0] : memref<2x128xf32, #tpu.memory_space<vmem>>, vector<2x128xf32>
    %c0_1 = arith.constant 0 : index
    %c0_2 = arith.constant 0 : index
    %1 = vector.load %arg2[%c0_1, %c0_2] : memref<1x128xf32, #tpu.memory_space<vmem>>, vector<1x128xf32>
    %c0_3 = arith.constant 0 : index
    %c0_4 = arith.constant 0 : index
    %2 = vector.load %arg3[%c0_3, %c0_4] : memref<1x128xf32, #tpu.memory_space<vmem>>, vector<1x128xf32>
    %c0_5 = arith.constant 0 : index
    %3 = memref.load %arg5[%c0_5] : memref<1xf32, #tpu.memory_space<smem>>
    %4 = vector.broadcast %1 : vector<1x128xf32> to vector<2x128xf32>
    %5 = arith.mulf %0, %4 : vector<2x128xf32>
    %c0_6 = arith.constant 0 : index
    %c0_7 = arith.constant 0 : index
    %6 = vector.load %arg4[%c0_6, %c0_7] : memref<128x128xf32, #tpu.memory_space<vmem>>, vector<128x128xf32>
    %cst = arith.constant dense<0.000000e+00> : vector<2x128xf32>
    %7 = tpu.matmul %5, %6, %cst {dimension_numbers = #tpu.dot_dimension_numbers<[1], [0], [0], [1], [0, 0, 1, 1], [], []>, precision = #tpu.contract_precision<fp32>} : vector<2x128xf32>, vector<128x128xf32>, vector<2x128xf32> -> vector<2x128xf32>
    %8 = vector.broadcast %3 : f32 to vector<2x128xf32>
    %9 = arith.addf %7, %8 : vector<2x128xf32>
    %10 = math.tanh %9 : vector<2x128xf32>
    %11 = vector.broadcast %2 : vector<1x128xf32> to vector<2x128xf32>
    %12 = arith.mulf %11, %10 : vector<2x128xf32>
    %13 = arith.addf %0, %12 : vector<2x128xf32>
    %c0_8 = arith.constant 0 : index
    %c0_9 = arith.constant 0 : index
    %14 = vector.load %arg6[%c0_8, %c0_9] : memref<2x128xf32, #tpu.memory_space<vmem>>, vector<2x128xf32>
    tpu.vector_store %arg6[%c0_8, %c0_9], %13 {strides = array<i32>} : memref<2x128xf32, #tpu.memory_space<vmem>>, vector<2x128xf32>,
    return
  }
  func.func @transform_0(%arg0: i32) -> (i32, i32) {
    %c0_i32 = arith.constant 0 : i32
    %c0_i32_0 = arith.constant 0 : i32
    return %arg0, %c0_i32 : i32, i32
  }
  func.func @transform_1(%arg0: i32) -> (i32, i32) {
    %c0_i32 = arith.constant 0 : i32
    %c0_i32_0 = arith.constant 0 : i32
    %c0_i32_1 = arith.constant 0 : i32
    return %c0_i32, %c0_i32_0 : i32, i32
  }
  func.func @transform_2(%arg0: i32) -> (i32, i32) {
    %c0_i32 = arith.constant 0 : i32
    %c0_i32_0 = arith.constant 0 : i32
    %c0_i32_1 = arith.constant 0 : i32
    return %c0_i32, %c0_i32_0 : i32, i32
  }
  func.func @transform_3(%arg0: i32) -> (i32, i32) {
    %c0_i32 = arith.constant 0 : i32
    %c0_i32_0 = arith.constant 0 : i32
    %c0_i32_1 = arith.constant 0 : i32
    return %c0_i32, %c0_i32_0 : i32, i32
  }
  func.func @transform_4(%arg0: i32) -> i32 {
    %c0_i32 = arith.constant 0 : i32
    %c0_i32_0 = arith.constant 0 : i32
    return %c0_i32 : i32
  }
  func.func @transform_5(%arg0: i32) -> (i32, i32) {
    %c0_i32 = arith.constant 0 : i32
    %c0_i32_0 = arith.constant 0 : i32
    return %arg0, %c0_i32 : i32, i32
  }
}

</mosaic_0001>

<bundles_post_ra>
// kernel: tpu_custom_call.1
= control target key start
LH: loop header
LB: loop body
LE: loop exit
PB: predicated region body
PF: predicated region fallthrough
CT: control target
= control target key end

     0   :  { %11 = vsyncpa [#allocation4], 0  ;;  %s1587_s0 = inlined_call_operand.vmem [shape: f32[2,128], index: 0, kind: input, shape index: {}]   ;;  %s1588_s1 = inlined_call_operand.vmem [shape: f32[1,128], index: 1, kind: input, shape index: {}]   ;;  %s1589_s2 = inlined_call_operand.vmem [shape: f32[1,128], index: 2, kind: input, shape index: {}]   ;;  %s1590_s3 = inlined_call_operand.hbm [shape: f32[128,128], index: 3, kind: input, shape index: {}]   ;;  %s1591_s4 = inlined_call_operand.<no memory space> [shape: f32[1], index: 4, kind: input, shape index: {}]   ;;  %s1592_s5 = inlined_call_operand.hbm [shape: f32[2,128], index: 5, kind: output, shape index: {}]  }
   0x1   :  { %12 = vsyncpa [#allocation5], 0  ;;  %s1255_s18 = smov [#allocation3]   ;;  %s1207_s22 = scalar_lea.hbm %s1590_s3, 2048 }
   0x2   :  { %s24_s19 = sshll.u32 %s1255_s18, 4  ;;  %p1208_p0 = scmp.ne.s32.totalorder %s1590_s3, %s1207_s22  ;;  %s25_s19 = int_to_ptr.vmem [resolvable:$true] %s24_s19 }
   0x3   :  { %p1211_p1 = scmp.lt.u32.totalorder %s1207_s22, %s1590_s3 }
   0x5   :  { %p1213_p2 = pnand %p1211_p1, %p1208_p0 }
   0x7   :  { %1216 = shalt.err (!%p1213_p2)
}
   0x8   :  { %s1217_s27 = scalar_lea.vmem %s25_s19, 2048  ;;  %p1222_p4 = scmp.lt.s32.totalorder %s25_s19, %s25_s19 }
   0x9   :  { %p1218_p3 = scmp.ne.s32.totalorder %s25_s19, %s1217_s27  ;;  %p1223_p5 = scmp.lt.s32.totalorder %s1217_s27, %s1217_s27 }
   0xb   :  { %p1224_p6 = por %p1223_p5, %p1222_p4 }
   0xd   :  { %p1225_p7 = pnand %p1224_p6, %p1218_p3 }
   0xf   :  { %1228 = shalt.err (!%p1225_p7)
}
  0x10   :  { %s1256_s28 = smov 128   ;;  %s1257_s29 = smov 8  }
  0x11   :  { %30 = dma.hbm_to_vmem [thread:$0]  %s1590_s3, 2048, %s25_s19, [#allocation4], %s1256_s28, %s1256_s28, %s1257_s29  }
  0x12   :  { %1251 = dma.done.wait [#allocation4], 2048  }
  0x13   :  { %1252 = vsyncadd [#allocation4], 4294965248  ;;  %v1258_v0 = vmov 0.0|0.0   ;;  %vm1259_vm0 = vmmov 0   ;;  %v1260_v1 = vmov 0.0   ;;  %v47_v2 = vld [vmem:[#allocation3] sm:$0xff] }
  0x14   :  { %1044 = vmatprep.subr.bf16.mxu1 %v1258_v0  ;;  %1116 = vmatprep.subr.bf16.mxu0 %v1258_v0  ;;  %v48_v3 = vld [vmem:[#allocation3 + $0x8] sm:$0xff]  ;;  %v49_v4 = vld [vmem:[#allocation3 + $0x10] sm:$0xff]  ;;  %v65_v5 = vand.u32 4294901760, %v47_v2  ;;  %v50_v7 = vld [vmem:[#allocation3 + $0x18] sm:$0xff]  ;;  %s1261_s12 = smov [#allocation6]  }
  0x15   :  { %866 = vmatprep.mubr.msk.f32.mxu1 %vm1259_vm0, %v1260_v1  ;;  %971 = vmatprep.mubr.msk.f32.mxu0 %vm1259_vm0, %v1260_v1  ;;  %v68_v6 = vand.u32 4294901760, %v48_v3  ;;  %v71_v8 = vand.u32 4294901760, %v49_v4  ;;  %v74_v9 = vand.u32 4294901760, %v50_v7  ;;  %v51_v10 = vld [vmem:[#allocation3 + $0x20] sm:$0xff]  ;;  %v52_v11 = vld [vmem:[#allocation3 + $0x28] sm:$0xff]  ;;  %v1318_v16 = vld [vmem:[#allocation3 + $0x30] sm:$0xff] }
  0x16   :  { %v77_v14 = vand.u32 4294901760, %v51_v10  ;;  %v80_v15 = vand.u32 4294901760, %v52_v11  ;;  %v1320_v17 = vld [vmem:[#allocation3 + $0x38] sm:$0xff]  ;;  %v83_v19 = vand.u32 4294901760, %v1318_v16  ;;  %v1331_v21 = vld [vmem:[%s1587_s0] sm:$0x3]  ;;  %v1355_v31 = vsub.f32 %v47_v2, %v65_v5 }
  0x17   :  { %v1310_v12 = vpack.c.bf16 %v68_v6, %v65_v5  ;;  %v1314_v13 = vpack.c.bf16 %v74_v9, %v71_v8  ;;  %v86_v20 = vand.u32 4294901760, %v1320_v17  ;;  %v730_v22 = vld [vmem:[%s1588_s1] ss:$0 sm:$0xff]  ;;  %v1340_v24 = vld [vmem:[#allocation3 + $0x48] sm:$0xff]  ;;  %v1351_v29 = vld [vmem:[#allocation3 + $0x50] sm:$0xff]  ;;  %v1359_v33 = vsub.f32 %v48_v3, %v68_v6  ;;  %s721_s13 = sshll.u32 %s1261_s12, 4  ;;  %s722_s13 = int_to_ptr.vmem [resolvable:$true] %s721_s13 }
  0x18   :  { %v1324_v18 = vpack.c.bf16 %v80_v15, %v77_v14  ;;  %v1338_v23 = vld [vmem:[#allocation3 + $0x40] sm:$0xff]  ;;  %v46_v25 = vmul.f32 %v730_v22, %v1331_v21  ;;  %v92_v28 = vand.u32 4294901760, %v1340_v24  ;;  %v1353_v30 = vld [vmem:[#allocation3 + $0x58] sm:$0xff]  ;;  %v95_v35 = vand.u32 4294901760, %v1351_v29  ;;  %v1371_v38 = vld [vmem:[#allocation3 + $0x68] sm:$0xff]  ;;  %p1234_p9 = scmp.lt.s32.totalorder %s722_s13, %s722_s13 }
  0x19   :  { %1046 = vmatpush3.bf16.msra.mxu1 %v1310_v12  ;;  %1118 = vmatpush3.bf16.msra.mxu0 %v1310_v12  ;;  %v1345_v26 = vpack.c.bf16 %v86_v20, %v83_v19  ;;  %v89_v27 = vand.u32 4294901760, %v1338_v23  ;;  %v98_v36 = vand.u32 4294901760, %v1353_v30  ;;  %v1367_v37 = vld [vmem:[#allocation3 + $0x60] sm:$0xff]  ;;  %v1373_v39 = vsub.f32 %v49_v4, %v71_v8  ;;  %v1390_v45 = vld [vmem:[#allocation3 + $0x70] sm:$0xff]  ;;  %v1392_v46 = vld [vmem:[#allocation3 + $0x78] sm:$0xff] }
  0x1a   :  { %1047 = vmatprep.subr.bf16.mxu1 %v1258_v0  ;;  %1119 = vmatprep.subr.bf16.mxu0 %v1258_v0  ;;  %v1357_v32 = vand.u32 4294901760, %v46_v25  ;;  %v1375_v40 = vsub.f32 %v50_v7, %v74_v9  ;;  %v101_v41 = vand.u32 4294901760, %v1367_v37  ;;  %v104_v44 = vand.u32 4294901760, %v1371_v38 }
  0x1b   :  { %v1363_v34 = vpack.c.bf16 %v92_v28, %v89_v27  ;;  %v1387_v43 = vpack.c.bf16 %v98_v36, %v95_v35  ;;  %v158_v47 = vand.u32 4294901760, %v1355_v31  ;;  %v165_v48 = vand.u32 4294901760, %v1359_v33 }
  0x1c   :  { %v1379_v42 = vsub.f32 %v46_v25, %v1357_v32  ;;  %v1398_v49 = vsub.f32 %v51_v10, %v77_v14  ;;  %v1400_v50 = vsub.f32 %v52_v11, %v80_v15  ;;  %v107_v51 = vand.u32 4294901760, %v1390_v45 }
  0x1d   :  { %1049 = vmatpush3.bf16.msra.mxu1 %v1314_v13  ;;  %1121 = vmatpush3.bf16.msra.mxu0 %v1314_v13  ;;  %v110_v52 = vand.u32 4294901760, %v1392_v46  ;;  %v172_v54 = vand.u32 4294901760, %v1373_v39  ;;  %v1412_v55 = vpack.c.bf16 %v104_v44, %v101_v41  ;;  %v159_v56 = vsub.f32 %v1355_v31, %v158_v47 }
  0x1e   :  { %1050 = vmatprep.subr.bf16.mxu1 %v1258_v0  ;;  %1122 = vmatprep.subr.bf16.mxu0 %v1258_v0  ;;  %v147_v53 = vand.u32 4294901760, %v1379_v42  ;;  %v166_v57 = vsub.f32 %v1359_v33, %v165_v48  ;;  %v179_v58 = vand.u32 4294901760, %v1375_v40  ;;  %v1420_v59 = vsub.f32 %v1318_v16, %v83_v19 }
  0x1f   :  { %v1423_v60 = vsub.f32 %v1320_v17, %v86_v20  ;;  %v173_v62 = vsub.f32 %v1373_v39, %v172_v54  ;;  %v186_v63 = vand.u32 4294901760, %v1398_v49  ;;  %v193_v2 = vand.u32 4294901760, %v1400_v50 }
  0x20   :  { %v148_v61 = vsub.f32 %v1379_v42, %v147_v53  ;;  %v1435_v3 = vpack.c.bf16 %v110_v52, %v107_v51  ;;  %v160_v4 = vand.u32 4294901760, %v159_v56  ;;  %v167_v5 = vand.u32 4294901760, %v166_v57 }
  0x21   :  { %1052 = vmatpush3.bf16.msra.mxu1 %v1324_v18  ;;  %1124 = vmatpush3.bf16.msra.mxu0 %v1324_v18  ;;  %v180_v6 = vsub.f32 %v1375_v40, %v179_v58  ;;  %v1441_v7 = vsub.f32 %v1338_v23, %v89_v27  ;;  %v1444_v8 = vsub.f32 %v1340_v24, %v92_v28  ;;  %v174_v11 = vand.u32 4294901760, %v173_v62 }
  0x22   :  { %1053 = vmatprep.subr.bf16.mxu1 %v1258_v0  ;;  %1125 = vmatprep.subr.bf16.mxu0 %v1258_v0  ;;  %v1141_v9 = vpack.c.bf16 %v165_v48, %v158_v47  ;;  %v149_v10 = vand.u32 4294901760, %v148_v61  ;;  %v187_v14 = vsub.f32 %v1398_v49, %v186_v63  ;;  %v194_v15 = vsub.f32 %v1400_v50, %v193_v2 }
  0x23   :  { %v1069_v16 = vpack.c.bf16 %v167_v5, %v160_v4  ;;  %v181_v17 = vand.u32 4294901760, %v180_v6  ;;  %v200_v19 = vand.u32 4294901760, %v1420_v59  ;;  %v207_v20 = vand.u32 4294901760, %v1423_v60 }
  0x24   :  { %v1457_v22 = vsub.f32 %v1351_v29, %v95_v35  ;;  %v1462_v23 = vsub.f32 %v1353_v30, %v98_v36  ;;  %v1144_v24 = vpack.c.bf16 %v179_v58, %v172_v54  ;;  %v188_v25 = vand.u32 4294901760, %v187_v14 }
  0x25   :  { %1055 = vmatpush3.bf16.msra.mxu1 %v1345_v26  ;;  %1127 = vmatpush3.bf16.msra.mxu0 %v1345_v26  ;;  %v195_v27 = vand.u32 4294901760, %v194_v15  ;;  %v214_v28 = vand.u32 4294901760, %v1441_v7  ;;  %v1072_v47 = vpack.c.bf16 %v181_v17, %v174_v11  ;;  %v201_v48 = vsub.f32 %v1420_v59, %v200_v19 }
  0x26   :  { %1056 = vmatprep.subr.bf16.mxu1 %v1258_v0  ;;  %1128 = vmatprep.subr.bf16.mxu0 %v1258_v0  ;;  %v208_v29 = vsub.f32 %v1423_v60, %v207_v20  ;;  %v221_v35 = vand.u32 4294901760, %v1444_v8  ;;  %v1473_v30 = vsub.f32 %v1367_v37, %v101_v41  ;;  %v1478_v36 = vsub.f32 %v1371_v38, %v104_v44 }
  0x27   :  { %v1147_v54 = vpack.c.bf16 %v193_v2, %v186_v63  ;;  %v215_v56 = vsub.f32 %v1441_v7, %v214_v28  ;;  %v228_v57 = vand.u32 4294901760, %v1457_v22  ;;  %v202_v37 = vand.u32 4294901760, %v201_v48 }
  0x28   :  { %v209_v41 = vand.u32 4294901760, %v208_v29  ;;  %v222_v58 = vsub.f32 %v1444_v8, %v221_v35  ;;  %v235_v38 = vand.u32 4294901760, %v1462_v23  ;;  %v1493_v44 = vsub.f32 %v1390_v45, %v107_v51 }
  0x29   :  { %1058 = vmatpush3.bf16.msra.mxu1 %v1363_v34  ;;  %1130 = vmatpush3.bf16.msra.mxu0 %v1363_v34  ;;  %v1498_v61 = vsub.f32 %v1392_v46, %v110_v52  ;;  %v1150_v62 = vpack.c.bf16 %v207_v20, %v200_v19  ;;  %v216_v63 = vand.u32 4294901760, %v215_v56  ;;  %v229_v2 = vsub.f32 %v1457_v22, %v228_v57 }
  0x2a   :  { %1059 = vmatprep.subr.bf16.mxu1 %v1258_v0  ;;  %1131 = vmatprep.subr.bf16.mxu0 %v1258_v0  ;;  %v242_v4 = vand.u32 4294901760, %v1473_v30  ;;  %v1078_v5 = vpack.c.bf16 %v209_v41, %v202_v37  ;;  %v223_v6 = vand.u32 4294901760, %v222_v58  ;;  %v249_v45 = vand.u32 4294901760, %v1478_v36 }
  0x2b   :  { %v1153_v46 = vpack.c.bf16 %v221_v35, %v214_v28  ;;  %v230_v51 = vand.u32 4294901760, %v229_v2  ;;  %v1156_v17 = vpack.c.bf16 %v235_v38, %v228_v57  ;;  %v1096_v56 = vpack.c.bf16 %v1375_v40, %v1373_v39 }
  0x2c   :  { %v243_v52 = vsub.f32 %v1473_v30, %v242_v4  ;;  %v1081_v11 = vpack.c.bf16 %v223_v6, %v216_v63  ;;  %v250_v15 = vsub.f32 %v1478_v36, %v249_v45 }
  0x2d   :  { %1061 = vmatpush3.bf16.msra.mxu1 %v1387_v43  ;;  %1133 = vmatpush3.bf16.msra.mxu0 %v1387_v43 }
  0x2e   :  { %1062 = vmatprep.subr.bf16.mxu1 %v1258_v0  ;;  %1134 = vmatprep.subr.bf16.mxu0 %v1258_v0  ;;  %v244_v19 = vand.u32 4294901760, %v243_v52 }
  0x31   :  { %1064 = vmatpush3.bf16.msra.mxu1 %v1412_v55  ;;  %1136 = vmatpush3.bf16.msra.mxu0 %v1412_v55 }
  0x32   :  { %1065 = vmatprep.subr.bf16.mxu1 %v1258_v0  ;;  %1137 = vmatprep.subr.bf16.mxu0 %v1258_v0 }
  0x35   :  { %1067 = vmatpush3.bf16.msra.mxu1 %v1435_v3  ;;  %1139 = vmatpush3.bf16.msra.mxu0 %v1435_v3 }
  0x36   :  { %1068 = vmatprep.subr.bf16.mxu1 %v1258_v0  ;;  %1140 = vmatprep.subr.bf16.mxu0 %v1258_v0 }
  0x38   :  { %867 = vmatmul.mubr.f32.vlgmr.msra.gmra.mrb[0].mxu1 %v149_v10  ;;  %972 = vmatmul.mubr.f32.vlgmr.msra.gmra.mrb[0].mxu0 %v147_v53  ;;  %v1075_v53 = vpack.c.bf16 %v195_v27, %v188_v25  ;;  %v256_v10 = vand.u32 4294901760, %v1493_v44 }
  0x39   :  { %1070 = vmatpush3.bf16.msra.mxu1 %v1069_v16  ;;  %1142 = vmatpush3.bf16.msra.mxu0 %v1141_v9  ;;  %v236_v9 = vsub.f32 %v1462_v23, %v235_v38  ;;  %v263_v16 = vand.u32 4294901760, %v1498_v61 }
  0x3a   :  { %1071 = vmatprep.subr.bf16.mxu1 %v1258_v0  ;;  %1143 = vmatprep.subr.bf16.mxu0 %v1258_v0  ;;  %v257_v25 = vsub.f32 %v1493_v44, %v256_v10 }
  0x3b   :  { %901 = vmatprep.mubr.msk.f32.mxu1 %vm1259_vm0, %v1260_v1  ;;  %1006 = vmatprep.mubr.msk.f32.mxu0 %vm1259_vm0, %v1260_v1  ;;  %v237_v14 = vand.u32 4294901760, %v236_v9  ;;  %v264_v27 = vsub.f32 %v1498_v61, %v263_v16 }
  0x3c   :  { %v258_v48 = vand.u32 4294901760, %v257_v25 }
  0x3d   :  { %1073 = vmatpush3.bf16.msra.mxu1 %v1072_v47  ;;  %1145 = vmatpush3.bf16.msra.mxu0 %v1144_v24  ;;  %v1084_v20 = vpack.c.bf16 %v237_v14, %v230_v51  ;;  %v251_v24 = vand.u32 4294901760, %v250_v15  ;;  %v1159_v47 = vpack.c.bf16 %v249_v45, %v242_v4  ;;  %v265_v29 = vand.u32 4294901760, %v264_v27 }
  0x3e   :  { %1074 = vmatprep.subr.bf16.mxu1 %v1258_v0  ;;  %1146 = vmatprep.subr.bf16.mxu0 %v1258_v0 }
  0x3f   :  { %v1087_v28 = vpack.c.bf16 %v251_v24, %v244_v19  ;;  %v1090_v35 = vpack.c.bf16 %v265_v29, %v258_v48 }
  0x41   :  { %1076 = vmatpush3.bf16.msra.mxu1 %v1075_v53  ;;  %1148 = vmatpush3.bf16.msra.mxu0 %v1147_v54  ;;  %v1162_v53 = vpack.c.bf16 %v263_v16, %v256_v10  ;;  %v1093_v54 = vpack.c.bf16 %v1359_v33, %v1355_v31  ;;  %v1099_v31 = vpack.c.bf16 %v1400_v50, %v1398_v49  ;;  %v63_v33 = vstv %s1591_s4  ;;  %s1229_s4 = scalar_lea.vmem %s722_s13, 32 }
  0x42   :  { %1077 = vmatprep.subr.bf16.mxu1 %v1258_v0  ;;  %1149 = vmatprep.subr.bf16.mxu0 %v1258_v0  ;;  %p1230_p8 = scmp.ne.s32.totalorder %s722_s13, %s1229_s4  ;;  %p1235_p10 = scmp.lt.s32.totalorder %s1229_s4, %s1229_s4 }
  0x44   :  { %p1236_p11 = por %p1235_p10, %p1234_p9 }
  0x45   :  { %1079 = vmatpush3.bf16.msra.mxu1 %v1078_v5  ;;  %1151 = vmatpush3.bf16.msra.mxu0 %v1150_v62 }
  0x46   :  { %1080 = vmatprep.subr.bf16.mxu1 %v1258_v0  ;;  %1152 = vmatprep.subr.bf16.mxu0 %v1258_v0  ;;  %p1237_p12 = pnand %p1236_p11, %p1230_p8 }
  0x49   :  { %1082 = vmatpush3.bf16.msra.mxu1 %v1081_v11  ;;  %1154 = vmatpush3.bf16.msra.mxu0 %v1153_v46 }
  0x4a   :  { %1083 = vmatprep.subr.bf16.mxu1 %v1258_v0  ;;  %1155 = vmatprep.subr.bf16.mxu0 %v1258_v0 }
  0x4d   :  { %1085 = vmatpush3.bf16.msra.mxu1 %v1084_v20  ;;  %1157 = vmatpush3.bf16.msra.mxu0 %v1156_v17 }
  0x4e   :  { %1086 = vmatprep.subr.bf16.mxu1 %v1258_v0  ;;  %1158 = vmatprep.subr.bf16.mxu0 %v1258_v0 }
  0x51   :  { %1088 = vmatpush3.bf16.msra.mxu1 %v1087_v28  ;;  %1160 = vmatpush3.bf16.msra.mxu0 %v1159_v47 }
  0x52   :  { %1089 = vmatprep.subr.bf16.mxu1 %v1258_v0  ;;  %1161 = vmatprep.subr.bf16.mxu0 %v1258_v0 }
  0x55   :  { %1091 = vmatpush3.bf16.msra.mxu1 %v1090_v35  ;;  %1163 = vmatpush3.bf16.msra.mxu0 %v1162_v53 }
  0x56   :  { %1092 = vmatprep.subr.bf16.mxu1 %v1258_v0  ;;  %1164 = vmatprep.subr.bf16.mxu0 %v1258_v0 }
  0x58   :  { %902 = vmatmul.mubr.f32.vlgmr.msra.gmra.mrb[0].mxu1 %v1357_v32  ;;  %1007 = vmatmul.mubr.f32.vlgmr.msra.gmra.mrb[0].mxu0 %v1357_v32 }
  0x59   :  { %1094 = vmatpush3.bf16.msra.mxu1 %v1093_v54  ;;  %1166 = vmatpush3.bf16.msra.mxu0 %v1310_v12  ;;  %v1102_v12 = vpack.c.bf16 %v1423_v60, %v1420_v59 }
  0x5a   :  { %1095 = vmatprep.subr.bf16.mxu1 %v1258_v0  ;;  %1167 = vmatprep.subr.bf16.mxu0 %v1258_v0 }
  0x5b   :  { %936 = vmatprep.mubr.msk.f32.mxu1 %vm1259_vm0, %v1260_v1  ;;  %1041 = vmatprep.mubr.msk.f32.mxu0 %vm1259_vm0, %v1260_v1  ;;  %v1105_v1 = vpack.c.bf16 %v1444_v8, %v1441_v7 }
  0x5d   :  { %1097 = vmatpush3.bf16.msra.mxu1 %v1096_v56  ;;  %1169 = vmatpush3.bf16.msra.mxu0 %v1314_v13  ;;  %v1108_v13 = vpack.c.bf16 %v1462_v23, %v1457_v22 }
  0x5e   :  { %1098 = vmatprep.subr.bf16.mxu1 %v1258_v0  ;;  %1170 = vmatprep.subr.bf16.mxu0 %v1258_v0 }
  0x61   :  { %1100 = vmatpush3.bf16.msra.mxu1 %v1099_v31  ;;  %1172 = vmatpush3.bf16.msra.mxu0 %v1324_v18  ;;  %v1111_v18 = vpack.c.bf16 %v1478_v36, %v1473_v30 }
  0x62   :  { %1101 = vmatprep.subr.bf16.mxu1 %v1258_v0  ;;  %1173 = vmatprep.subr.bf16.mxu0 %v1258_v0 }
  0x65   :  { %1103 = vmatpush3.bf16.msra.mxu1 %v1102_v12  ;;  %1175 = vmatpush3.bf16.msra.mxu0 %v1345_v26  ;;  %v1114_v26 = vpack.c.bf16 %v1498_v61, %v1493_v44 }
  0x66   :  { %1104 = vmatprep.subr.bf16.mxu1 %v1258_v0  ;;  %1176 = vmatprep.subr.bf16.mxu0 %v1258_v0 }
  0x69   :  { %1106 = vmatpush3.bf16.msra.mxu1 %v1105_v1  ;;  %1178 = vmatpush3.bf16.msra.mxu0 %v1363_v34 }
  0x6a   :  { %1107 = vmatprep.subr.bf16.mxu1 %v1258_v0  ;;  %1179 = vmatprep.subr.bf16.mxu0 %v1258_v0 }
  0x6d   :  { %1109 = vmatpush3.bf16.msra.mxu1 %v1108_v13  ;;  %1181 = vmatpush3.bf16.msra.mxu0 %v1387_v43 }
  0x6e   :  { %1110 = vmatprep.subr.bf16.mxu1 %v1258_v0  ;;  %1182 = vmatprep.subr.bf16.mxu0 %v1258_v0 }
  0x71   :  { %1112 = vmatpush3.bf16.msra.mxu1 %v1111_v18  ;;  %1184 = vmatpush3.bf16.msra.mxu0 %v1412_v55 }
  0x72   :  { %1113 = vmatprep.subr.bf16.mxu1 %v1258_v0  ;;  %1185 = vmatprep.subr.bf16.mxu0 %v1258_v0  ;;  %v731_v0 = vld [vmem:[%s1589_s2] ss:$0 sm:$0xff] }
  0x75   :  { %1115 = vmatpush3.bf16.msra.mxu1 %v1114_v26  ;;  %1187 = vmatpush3.bf16.msra.mxu0 %v1435_v3 }
  0x78   :  { %937 = vmatmul.mubr.f32.vlgmr.msra.gmra.mrb[0].mxu1 %v1379_v42  ;;  %1042 = vmatmul.mubr.f32.vlgmr.msra.gmra.mrb[0].mxu0 %v1357_v32 }
 0x14b   :  { %v406_v34 = vpop.f32.mrb[0].mxu1  ;;  %v701_v39 = vpop.f32.mrb[0].mxu0 }
 0x14c   :  { %v1188_v40 = vadd.f32 %v406_v34, %v63_v33  ;;  %v938_v43 = vpop.f32.mrb[1].mxu1  ;;  %v1043_v49 = vpop.f32.mrb[1].mxu0 }
 0x14e   :  { %v1189_v50 = vadd.f32 %v1188_v40, %v701_v39 }
 0x150   :  { %1205 = vtanh.f32 %v1189_v50 }
 0x15a   :  { %v1206_v55 = vpop.eup %1205 }
 0x15b   :  { %v712_v42 = vmul.f32 %v1206_v55, %v731_v0 }
 0x15d   :  { %v713_v32 = vadd.f32 %v712_v42, %v1331_v21 }
 0x15f   :  { %714 = vst [vmem:[#allocation6] sm:$0x3] %v713_v32 }
 0x160   :  { %1240 = shalt.err (!%p1237_p12)
}
 0x161   :  { %s1241_s16 = scalar_lea.hbm %s1592_s5, 32 }
 0x162   :  { %p1242_p13 = scmp.ne.s32.totalorder %s1592_s5, %s1241_s16  ;;  %p1245_p0 = scmp.lt.u32.totalorder %s1241_s16, %s1592_s5 }
 0x164   :  { %p1247_p1 = pnand %p1245_p0, %p1242_p13 }
 0x166   :  { %1250 = shalt.err (!%p1247_p1)
}
 0x167   :  { %724 = dma.vmem_to_hbm [thread:$0]  %s722_s13, 32, %s1592_s5, [#allocation5]  }
 0x168   :  { %1253 = dma.done.wait [#allocation5], 32  }
 0x169   :  { %1254 = vsyncadd [#allocation5], 4294967264 }
 0x16a   :  { %728 = vsyncpa [#allocation4], 1 }
 0x16b   :  { %729 = vsyncpa [#allocation5], 1 }

</bundles_post_ra>
